<compile_context>
chip_gen: v5e
topology: v5e:2x2
jax: 0.10.0
libtpu: 0.0.40
codegen_flags: <defaults>
</compile_context>

<pallas_src>
import functools

import jax
import jax.numpy as jnp
from jax.experimental import pallas as pl
from jax.experimental.pallas import tpu as pltpu

_LANES = 128  # vreg lane width; 128-wide K/N matches the v5e MXU exactly and
              # is fine on v6e/v7x (the kernel is HBM-bandwidth-bound).


def _round_up(a, b):
    return ((a + b - 1) // b) * b


def _rnn3d_fc_kernel(x_ref, w_ref, b_ref, o_ref):
    # x_ref: (TM, Cp)  lane-dense packed input rows
    # w_ref: (Cp, Cp)  block-diagonal folded weight (resident across grid)
    # b_ref: (1,  Cp)  tiled bias (f32)
    # o_ref: (TM, Cp)
    o_ref[...] = (
        jnp.dot(x_ref[...], w_ref[...], preferred_element_type=jnp.float32)
        + b_ref[...]
    ).astype(o_ref.dtype)


def fold_fc_params(fc_weight, fc_bias, dtype=jnp.float32):
    """Precompute (once) the folded, lane-packed fc parameters.

    fc_weight: (C, 3C) torch Linear layout (out, in); fc_bias: (C,).
    Returns (w_block (Cp,Cp), b_block (1,Cp) f32, pack).
    """
    C = fc_weight.shape[0]
    assert fc_weight.shape == (C, 3 * C), "union='cat' requires fc: 3C -> C"
    # concat([x, x, x], -1) @ W.T == x @ (W[:, :C] + W[:, C:2C] + W[:, 2C:]).T
    wt = fc_weight.T.astype(jnp.float32)                    # (3C, C)
    w_sum = wt[0:C] + wt[C:2 * C] + wt[2 * C:3 * C]         # (C, C)

    # Lane-dense repack factor: `pack` rows of width C -> 1 row of width Cp.
    pack = _LANES // C if (_LANES % C == 0 and C <= _LANES) else 1
    Cp = pack * C
    w_block = jnp.kron(jnp.eye(pack, dtype=jnp.float32), w_sum).astype(dtype)
    b_block = jnp.tile(fc_bias.astype(jnp.float32), pack).reshape(1, Cp)
    return w_block, b_block, pack


def rnn3d_base_forward_folded(x, w_block, b_block, *, pack, tm=4096):
    """RNN3DBase forward given pre-folded params (see fold_fc_params)."""
    B, D, H, W, C = x.shape
    N = B * D * H * W
    dtype = x.dtype
    Cp = pack * C

    itemsize = jnp.dtype(dtype).itemsize
    sub = max(8, 32 // max(itemsize, 1))   # sublane tile: f32=8, bf16=16, i8=32

    # --- minimal pad: only to the pack granularity (<= pack-1 rows) --------
    n_pack = pl.cdiv(N, pack)
    rows_packed = n_pack * pack
    x_flat = x.reshape(N, C)
    if rows_packed != N:
        x_flat = jnp.pad(x_flat, ((0, rows_packed - N), (0, 0)))
    x_packed = x_flat.reshape(n_pack, Cp)   # contiguous, free reshape

    # --- tile: big blocks, but keep grid >= 2 so both v7x TCs get work -----
    half = _round_up(pl.cdiv(n_pack, 2), sub)
    tm_eff = max(sub, min(_round_up(tm, sub), half))
    grid = (pl.cdiv(n_pack, tm_eff),)       # partial last block handled by Pallas

    flops = 2 * n_pack * Cp * Cp
    bytes_accessed = (2 * n_pack * Cp + Cp * Cp + Cp) * itemsize

    out_packed = pl.pallas_call(
        _rnn3d_fc_kernel,
        out_shape=jax.ShapeDtypeStruct((n_pack, Cp), dtype),
        grid=grid,
        in_specs=[
            pl.BlockSpec((tm_eff, Cp), lambda i: (i, 0)),
            pl.BlockSpec((Cp, Cp), lambda i: (0, 0)),
            pl.BlockSpec((1, Cp), lambda i: (0, 0)),
        ],
        out_specs=pl.BlockSpec((tm_eff, Cp), lambda i: (i, 0)),
        compiler_params=pltpu.CompilerParams(
            dimension_semantics=("parallel",),
            vmem_limit_bytes=32 * 1024 * 1024,
        ),
        cost_estimate=pl.CostEstimate(
            flops=flops, transcendentals=0, bytes_accessed=bytes_accessed),
    )(x_packed, w_block, b_block)

    out_flat = out_packed.reshape(rows_packed, C)
    if rows_packed != N:
        out_flat = out_flat[:N]
    return out_flat.reshape(B, D, H, W, C)


def rnn3d_base_forward(x, fc_weight, fc_bias, *, tm=4096):
    """Convenience wrapper: folds params on every call (prefer the folded path)."""
    w_block, b_block, pack = fold_fc_params(fc_weight, fc_bias, dtype=x.dtype)
    return rnn3d_base_forward_folded(x, w_block, b_block, pack=pack, tm=tm)


def _reference_forward(x, fc_weight, fc_bias):
    # Pure-JAX mirror of the PyTorch forward (identity RNNs, union='cat').
    B, D, H, W, C = x.shape
    h = x
    v = jnp.transpose(
        jnp.transpose(x, (0, 1, 3, 2, 4)).reshape(B, D, W, H, C),
        (0, 1, 3, 2, 4))
    d = jnp.transpose(
        jnp.transpose(x, (0, 3, 2, 1, 4)).reshape(B, W, H, D, C),
        (0, 3, 2, 1, 4))
    cat = jnp.concatenate([v, h, d], axis=-1)
    return cat @ fc_weight.T + fc_bias


if __name__ == "__main__":
    # Module hyperparameters (defaults: bidirectional=True, union='cat',
    # with_fc=True). output_size = 2*hidden_size must equal C == input_size.
    hidden_size = 16
    C = 2 * hidden_size          # input_size == C == 32
    B, D, H, W = 2, 4, 8, 8      # N = 512 rows

    key = jax.random.PRNGKey(0)
    kx, kw, kb = jax.random.split(key, 3)

    x = jax.random.normal(kx, (B, D, H, W, C), dtype=jnp.float32)

    # Deterministic fc parameters (torch Linear layout: weight (out, in)).
    fan_in = 3 * C
    bound = 1.0 / (fan_in ** 0.5)
    fc_weight = jax.random.uniform(kw, (C, 3 * C), jnp.float32, -bound, bound)
    fc_bias = jax.random.uniform(kb, (C,), jnp.float32, -bound, bound)

    # Fold params once (hoisted out of the per-call path), jit the forward.
    w_block, b_block, pack = fold_fc_params(fc_weight, fc_bias, jnp.float32)
    fwd = jax.jit(functools.partial(rnn3d_base_forward_folded, pack=pack))

    out = fwd(x, w_block, b_block)
    out = jax.block_until_ready(out)

    ref = _reference_forward(x, fc_weight, fc_bias)
    assert out.shape == (B, D, H, W, C)
    # Weight folding changes f32 summation order slightly vs the reference.
    assert jnp.allclose(out, ref, atol=1e-4, rtol=1e-4)

    print("KERNEL_OK")
</pallas_src>

<mosaic_0001>
module attributes {stable_mosaic.version = 11 : i64} {
  func.func @_rnn3d_fc_kernel(%arg0: i32, %arg1: memref<64x128xf32, #tpu.memory_space<vmem>>, %arg2: memref<128x128xf32, #tpu.memory_space<vmem>>, %arg3: memref<1x128xf32, #tpu.memory_space<vmem>>, %arg4: memref<64x128xf32, #tpu.memory_space<vmem>>) attributes {dimension_semantics = [#tpu.dimension_semantics<parallel>], iteration_bounds = array<i64: 2>, scalar_prefetch = 0 : i64, scratch_operands = 0 : i64, tpu.core_type = #tpu.core_type<tc>, window_params = [{transform_indices = @transform_0, window_bounds = array<i64: 64, 128>}, {pipeline_mode = #tpu.pipeline_mode<synchronous>, transform_indices = @transform_1, window_bounds = array<i64: 128, 128>}, {pipeline_mode = #tpu.pipeline_mode<synchronous>, transform_indices = @transform_2, window_bounds = array<i64: 1, 128>}, {transform_indices = @transform_3, window_bounds = array<i64: 64, 128>}]} {
    %c0 = arith.constant 0 : index
    %c0_0 = arith.constant 0 : index
    %0 = vector.load %arg1[%c0, %c0_0] : memref<64x128xf32, #tpu.memory_space<vmem>>, vector<64x128xf32>
    %c0_1 = arith.constant 0 : index
    %c0_2 = arith.constant 0 : index
    %1 = vector.load %arg2[%c0_1, %c0_2] : memref<128x128xf32, #tpu.memory_space<vmem>>, vector<128x128xf32>
    %cst = arith.constant dense<0.000000e+00> : vector<64x128xf32>
    %2 = tpu.matmul %0, %1, %cst {dimension_numbers = #tpu.dot_dimension_numbers<[1], [0], [0], [1], [0, 0, 1, 1], [], []>} : vector<64x128xf32>, vector<128x128xf32>, vector<64x128xf32> -> vector<64x128xf32>
    %c0_3 = arith.constant 0 : index
    %c0_4 = arith.constant 0 : index
    %3 = vector.load %arg3[%c0_3, %c0_4] : memref<1x128xf32, #tpu.memory_space<vmem>>, vector<1x128xf32>
    %4 = vector.broadcast %3 : vector<1x128xf32> to vector<64x128xf32>
    %5 = arith.addf %2, %4 : vector<64x128xf32>
    %c0_5 = arith.constant 0 : index
    %c0_6 = arith.constant 0 : index
    %6 = vector.load %arg4[%c0_5, %c0_6] : memref<64x128xf32, #tpu.memory_space<vmem>>, vector<64x128xf32>
    tpu.vector_store %arg4[%c0_5, %c0_6], %5 {strides = array<i32>} : memref<64x128xf32, #tpu.memory_space<vmem>>, vector<64x128xf32>,
    return
  }
  func.func @transform_0(%arg0: i32) -> (i32, i32) {
    %c0_i32 = arith.constant 0 : i32
    %c0_i32_0 = arith.constant 0 : i32
    return %arg0, %c0_i32 : i32, i32
  }
  func.func @transform_1(%arg0: i32) -> (i32, i32) {
    %c0_i32 = arith.constant 0 : i32
    %c0_i32_0 = arith.constant 0 : i32
    %c0_i32_1 = arith.constant 0 : i32
    return %c0_i32, %c0_i32_0 : i32, i32
  }
  func.func @transform_2(%arg0: i32) -> (i32, i32) {
    %c0_i32 = arith.constant 0 : i32
    %c0_i32_0 = arith.constant 0 : i32
    %c0_i32_1 = arith.constant 0 : i32
    return %c0_i32, %c0_i32_0 : i32, i32
  }
  func.func @transform_3(%arg0: i32) -> (i32, i32) {
    %c0_i32 = arith.constant 0 : i32
    %c0_i32_0 = arith.constant 0 : i32
    return %arg0, %c0_i32 : i32, i32
  }
}

</mosaic_0001>

<bundles_post_ra>
// kernel: rnn3d_base_forward_folded.1
= control target key start
LH: loop header
LB: loop body
LE: loop exit
PB: predicated region body
PF: predicated region fallthrough
CT: control target
= control target key end

     0   :  { %s403_s12 = smov 0   ;;  %s480_s0 = inlined_call_operand.vmem [shape: f32[128,128], index: 0, kind: input, shape index: {}]   ;;  %s481_s1 = inlined_call_operand.vmem [shape: f32[128,128], index: 1, kind: input, shape index: {}]   ;;  %s482_s2 = inlined_call_operand.vmem [shape: f32[1,128], index: 2, kind: input, shape index: {}]   ;;  %s483_s3 = inlined_call_operand.vmem [shape: f32[128,128], index: 3, kind: output, shape index: {}]  }
   0x1 LB: > { %s307_s13 = sadd.s32 4294967295, %s381_s12   ;;  %p311_p0 = scmp.ge.s32.totalorder %s381_s12, 1  ;;  %s381_s12 = sphi %s403_s12, %s13_s12  }
   0x2   : > { %p138_p1 = scmp.lt.s32.totalorder %s381_s12, 3 }
   0x4   : > { %p139_p2 = pnand %p311_p0, %p138_p1 }
   0x5   : > { %s312_s30 = sshll.u32 (!%p139_p2), %s307_s13, 3 }
   0x6   : > { %142 = sbr.rel (%p139_p2) target bundleno = 187 (0xbb), region = 32  ;;  %p163_p3 = scmp.lt.s32.totalorder (!%p139_p2), %s312_s30, 15 }
   0xb   : > { %v197_v0 = vld [vmem:[%s481_s1 + $0x78] sm:$0xff]  ;;  %v196_v1 = vld [vmem:[%s481_s1 + $0x70] sm:$0xff]  ;;  %v195_v2 = vld [vmem:[%s481_s1 + $0x68] sm:$0xff]  ;;  %s485_s30 = smov (!%p163_p3, %s312_s30), 15 }
   0xc   : > { %319 = vmatpush.msra.mxu2 %v197_v0  ;;  %320 = vmatpush.msra.mxu3 %v197_v0  ;;  %v194_v3 = vld [vmem:[%s481_s1 + $0x60] sm:$0xff]  ;;  %v193_v4 = vld [vmem:[%s481_s1 + $0x58] sm:$0xff]  ;;  %v192_v5 = vld [vmem:[%s481_s1 + $0x50] sm:$0xff]  ;;  %s313_s15 = sshll.u32 %s485_s30, 3 }
   0xd   : > { %202 = vmatpush.msra.mxu0 %v197_v0  ;;  %318 = vmatpush.msra.mxu1 %v197_v0  ;;  %v191_v6 = vld [vmem:[%s481_s1 + $0x48] sm:$0xff]  ;;  %v190_v7 = vld [vmem:[%s481_s1 + $0x40] sm:$0xff]  ;;  %v189_v8 = vld [vmem:[%s481_s1 + $0x38] sm:$0xff]  ;;  %s166_s22 = scalar_lea.vmem %s480_s0, %s313_s15  ;;  %s172_s29 = scalar_lea.vmem %s483_s3, %s313_s15 }
   0xe   : > { %322 = vmatpush.msra.mxu2 %v196_v1  ;;  %323 = vmatpush.msra.mxu3 %v196_v1  ;;  %v188_v9 = vld [vmem:[%s481_s1 + $0x30] sm:$0xff]  ;;  %v187_v10 = vld [vmem:[%s481_s1 + $0x28] sm:$0xff]  ;;  %v186_v11 = vld [vmem:[%s481_s1 + $0x20] sm:$0xff] }
   0xf   : > { %203 = vmatpush.msra.mxu0 %v196_v1  ;;  %321 = vmatpush.msra.mxu1 %v196_v1  ;;  %v185_v12 = vld [vmem:[%s481_s1 + $0x18] sm:$0xff]  ;;  %v184_v13 = vld [vmem:[%s481_s1 + $0x10] sm:$0xff]  ;;  %v183_v14 = vld [vmem:[%s481_s1 + $0x8] sm:$0xff] }
  0x10   : > { %325 = vmatpush.msra.mxu2 %v195_v2  ;;  %326 = vmatpush.msra.mxu3 %v195_v2  ;;  %v182_v15 = vld [vmem:[%s481_s1] sm:$0xff]  ;;  %v180_v17 = vld [vmem:[%s166_s22 + $0x30] sm:$0xff]  ;;  %v179_v20 = vld [vmem:[%s166_s22 + $0x28] sm:$0xff] }
  0x11   : > { %204 = vmatpush.msra.mxu0 %v195_v2  ;;  %324 = vmatpush.msra.mxu1 %v195_v2  ;;  %v178_v16 = vld [vmem:[%s166_s22 + $0x20] sm:$0xff]  ;;  %v176_v19 = vld [vmem:[%s166_s22 + $0x10] sm:$0xff]  ;;  %v181_v21 = vld [vmem:[%s166_s22 + $0x38] sm:$0xff] }
  0x12   : > { %328 = vmatpush.msra.mxu2 %v194_v3  ;;  %329 = vmatpush.msra.mxu3 %v194_v3  ;;  %v174_v18 = vld [vmem:[%s166_s22] sm:$0xff]  ;;  %v175_v22 = vld [vmem:[%s166_s22 + $0x8] sm:$0xff]  ;;  %v177_v23 = vld [vmem:[%s166_s22 + $0x18] sm:$0xff] }
  0x13   : > { %205 = vmatpush.msra.mxu0 %v194_v3  ;;  %327 = vmatpush.msra.mxu1 %v194_v3  ;;  %v374_v24 = vld [vmem:[%s482_s2] ss:$0 sm:$0xff] }
  0x14   : > { %331 = vmatpush.msra.mxu2 %v193_v4  ;;  %332 = vmatpush.msra.mxu3 %v193_v4 }
  0x15   : > { %206 = vmatpush.msra.mxu0 %v193_v4  ;;  %330 = vmatpush.msra.mxu1 %v193_v4 }
  0x16   : > { %334 = vmatpush.msra.mxu2 %v192_v5  ;;  %335 = vmatpush.msra.mxu3 %v192_v5 }
  0x17   : > { %207 = vmatpush.msra.mxu0 %v192_v5  ;;  %333 = vmatpush.msra.mxu1 %v192_v5 }
  0x18   : > { %337 = vmatpush.msra.mxu2 %v191_v6  ;;  %338 = vmatpush.msra.mxu3 %v191_v6 }
  0x19   : > { %208 = vmatpush.msra.mxu0 %v191_v6  ;;  %336 = vmatpush.msra.mxu1 %v191_v6 }
  0x1a   : > { %340 = vmatpush.msra.mxu2 %v190_v7  ;;  %341 = vmatpush.msra.mxu3 %v190_v7 }
  0x1b   : > { %209 = vmatpush.msra.mxu0 %v190_v7  ;;  %339 = vmatpush.msra.mxu1 %v190_v7 }
  0x1c   : > { %343 = vmatpush.msra.mxu2 %v189_v8  ;;  %344 = vmatpush.msra.mxu3 %v189_v8 }
  0x1d   : > { %210 = vmatpush.msra.mxu0 %v189_v8  ;;  %342 = vmatpush.msra.mxu1 %v189_v8 }
  0x1e   : > { %346 = vmatpush.msra.mxu2 %v188_v9  ;;  %347 = vmatpush.msra.mxu3 %v188_v9 }
  0x1f   : > { %211 = vmatpush.msra.mxu0 %v188_v9  ;;  %345 = vmatpush.msra.mxu1 %v188_v9 }
  0x20   : > { %349 = vmatpush.msra.mxu2 %v187_v10  ;;  %350 = vmatpush.msra.mxu3 %v187_v10 }
  0x21   : > { %212 = vmatpush.msra.mxu0 %v187_v10  ;;  %348 = vmatpush.msra.mxu1 %v187_v10 }
  0x22   : > { %352 = vmatpush.msra.mxu2 %v186_v11  ;;  %353 = vmatpush.msra.mxu3 %v186_v11 }
  0x23   : > { %213 = vmatpush.msra.mxu0 %v186_v11  ;;  %351 = vmatpush.msra.mxu1 %v186_v11 }
  0x24   : > { %355 = vmatpush.msra.mxu2 %v185_v12  ;;  %356 = vmatpush.msra.mxu3 %v185_v12 }
  0x25   : > { %214 = vmatpush.msra.mxu0 %v185_v12  ;;  %354 = vmatpush.msra.mxu1 %v185_v12 }
  0x26   : > { %358 = vmatpush.msra.mxu2 %v184_v13  ;;  %359 = vmatpush.msra.mxu3 %v184_v13 }
  0x27   : > { %215 = vmatpush.msra.mxu0 %v184_v13  ;;  %357 = vmatpush.msra.mxu1 %v184_v13 }
  0x28   : > { %361 = vmatpush.msra.mxu2 %v183_v14  ;;  %362 = vmatpush.msra.mxu3 %v183_v14 }
  0x29   : > { %216 = vmatpush.msra.mxu0 %v183_v14  ;;  %360 = vmatpush.msra.mxu1 %v183_v14 }
  0x2a   : > { %364 = vmatpush.msra.mxu2 %v182_v15  ;;  %365 = vmatpush.msra.mxu3 %v182_v15 }
  0x2b   : > { %230 = vmatmul.f32.vlgmr.msra.gmra.mxu2 %v178_v16  ;;  %236 = vmatmul.f32.vlgmr.msra.gmra.mxu3 %v180_v17 }
  0x2c   : > { %217 = vmatpush.msra.mxu0 %v182_v15  ;;  %363 = vmatpush.msra.mxu1 %v182_v15 }
  0x2d   : > { %218 = vmatmul.f32.vlgmr.msra.gmra.mxu0 %v174_v18  ;;  %224 = vmatmul.f32.vlgmr.msra.gmra.mxu1 %v176_v19 }
  0x33   : > { %233 = vmatmul.f32.gmra.mxu2 %v179_v20  ;;  %239 = vmatmul.f32.gmra.mxu3 %v181_v21 }
  0x35   : > { %221 = vmatmul.f32.gmra.mxu0 %v175_v22  ;;  %227 = vmatmul.f32.gmra.mxu1 %v177_v23 }
  0xaa   : > { %v219_v25 = vpop.f32.mrf.mxu0  ;;  %v225_v26 = vpop.f32.mrf.mxu1 }
  0xab   : > { %v220_v27 = vadd.f32 %v374_v24, %v219_v25  ;;  %v226_v28 = vadd.f32 %v374_v24, %v225_v26 }
  0xad   : > { %243 = vst [vmem:[%s172_s29] sm:$0xff] %v220_v27 }
  0xae   : > { %245 = vst [vmem:[%s172_s29 + $0x10] sm:$0xff] %v226_v28  ;;  %v231_v29 = vpop.f32.mrf.mxu2  ;;  %v237_v30 = vpop.f32.mrf.mxu3 }
  0xaf   : > { %v232_v31 = vadd.f32 %v374_v24, %v231_v29  ;;  %v238_v32 = vadd.f32 %v374_v24, %v237_v30 }
  0xb1   : > { %247 = vst [vmem:[%s172_s29 + $0x20] sm:$0xff] %v232_v31 }
  0xb2   : > { %249 = vst [vmem:[%s172_s29 + $0x30] sm:$0xff] %v238_v32  ;;  %v222_v33 = vpop.f32.mrf.mxu0  ;;  %v228_v34 = vpop.f32.mrf.mxu1 }
  0xb3   : > { %v223_v35 = vadd.f32 %v374_v24, %v222_v33  ;;  %v229_v36 = vadd.f32 %v374_v24, %v228_v34 }
  0xb5   : > { %244 = vst [vmem:[%s172_s29 + $0x8] sm:$0xff] %v223_v35 }
  0xb6   : > { %246 = vst [vmem:[%s172_s29 + $0x18] sm:$0xff] %v229_v36  ;;  %v234_v37 = vpop.f32.mrf.mxu2  ;;  %v240_v38 = vpop.f32.mrf.mxu3 }
  0xb7   : > { %v235_v39 = vadd.f32 %v374_v24, %v234_v37  ;;  %v241_v40 = vadd.f32 %v374_v24, %v240_v38 }
  0xb9   : > { %248 = vst [vmem:[%s172_s29 + $0x28] sm:$0xff] %v235_v39 }
  0xba   : > { %250 = vst [vmem:[%s172_s29 + $0x38] sm:$0xff] %v241_v40 }
  0xbb PF: > { %s13_s12 = sadd.s32 1, %s381_s12  }
  0xbc   : > { %p10_p4 = scmp.ge.s32.totalorder %s13_s12, 4  }
  0xbe   :  { %12 = sbr.rel (!%p10_p4) target bundleno = 1 (0x1), region = 62 }

</bundles_post_ra>
